<compile_context>
chip_gen: v6e
topology: v6e:2x2x1
jax: 0.10.0
libtpu: 0.0.40
codegen_flags: <defaults>
</compile_context>

<pallas_src>
import functools

import jax
import jax.numpy as jnp
from jax import lax
from jax.experimental import pallas as pl
from jax.experimental.pallas import tpu as pltpu

_LANES = 128
_SUBLANES = 16          # sublane granularity safe for f32 and bf16 blocks
# Clamp the exp() argument so extreme (or garbage, masked-out) scores never reach
# inf before the reciprocal (exp(60) ~ 1e26 -> reciprocal ~ 0, identical to the
# true sigmoid tail in f32).
_EXP_CLAMP = 60.0


def _round_up(x: int, m: int) -> int:
    return ((x + m - 1) // m) * m


def _logistic_loss_kernel(pos_ref, neg_ref, out_ref, acc_ref, *,
                          n: int, inv_n: float, block_rows: int, steps: int):
    p = pl.program_id(0)          # partition (parallel) axis
    s = pl.program_id(1)          # row-chunk (reduction) axis

    @pl.when(s == 0)
    def _init():
        acc_ref[...] = jnp.zeros_like(acc_ref)

    # Global element index of every slot in this (block_rows, 128) tile.  Tiles
    # hanging past the end of the data (ragged last block, lane tail of the last
    # valid row, or the clamped duplicate blocks of the last partition) are masked
    # to contribute exactly zero — so the wrapper never needs sentinel padding.
    blk = p * steps + s                                   # nominal block index
    row = lax.broadcasted_iota(jnp.int32, acc_ref.shape, 0)
    lane = lax.broadcasted_iota(jnp.int32, acc_ref.shape, 1)
    idx = blk * (block_rows * _LANES) + row * _LANES + lane
    valid = idx < n

    pos = pos_ref[...].astype(jnp.float32)
    neg = neg_ref[...].astype(jnp.float32)

    # (1 - sigmoid(pos)) + sigmoid(neg) = 1/(1+exp(pos)) + 1/(1+exp(-neg)).
    # exp + approximate reciprocal both use the EUP slot; adds/select are cheap
    # VPU filler — the kernel is HBM-bandwidth bound.
    t_pos = pl.reciprocal(1.0 + jnp.exp(jnp.minimum(pos, _EXP_CLAMP)), approx=True)
    t_neg = pl.reciprocal(1.0 + jnp.exp(jnp.minimum(-neg, _EXP_CLAMP)), approx=True)

    # Pure elementwise accumulation each step (no per-step XLU reduce, no per-step
    # scalar store).  jnp.where uses select semantics, so garbage/NaN in masked
    # (out-of-bounds) slots never propagates.
    acc_ref[...] += jnp.where(valid, t_pos + t_neg, 0.0)

    @pl.when(s == pl.num_programs(1) - 1)
    def _finalize():
        # Single cross-lane reduction + 1/N scale, once per partition.
        partial = jnp.sum(acc_ref[...]) * inv_n
        out_ref[...] = jnp.full(out_ref.shape, partial, dtype=jnp.float32)


def logistic_loss(
    positive_score: jax.Array,
    negative_score: jax.Array,
    *,
    block_rows: int = 1024,
    num_parallel: int = 2,
) -> jax.Array:
    """Pallas implementation of catalyst's LogisticLoss.forward (mean over all elems)."""
    if positive_score.shape != negative_score.shape:
        raise ValueError(
            f"Shape mismatch: {positive_score.shape}, {negative_score.shape}"
        )
    n = positive_score.size
    if n == 0:
        raise ValueError("Empty input")
    dtype = positive_score.dtype  # keep original dtype in HBM (bf16 stays bf16)

    # --- layout: flatten -> lane-dense (rows, 128) slab.  Padding (with zeros —
    # values are irrelevant, the kernel masks by element index) is only added when
    # n is not already a multiple of 128*16; large lane-aligned inputs are reshaped
    # with zero extra HBM copies.
    rows = max(-(-n // _LANES), _SUBLANES)
    total = rows * _LANES
    pos = positive_score.reshape(-1)
    neg = negative_score.reshape(-1)
    pad = total - n
    if pad:
        zeros = jnp.zeros((pad,), dtype=dtype)
        pos = jnp.concatenate([pos, zeros])
        neg = jnp.concatenate([neg, zeros])
    pos2d = pos.reshape(rows, _LANES)
    neg2d = neg.reshape(rows, _LANES)

    # Block rows: multiple of 16 sublanes, never taller than the array.
    br = min(_round_up(block_rows, _SUBLANES), (rows // _SUBLANES) * _SUBLANES)
    blocks_total = -(-rows // br)             # last block may be ragged (masked)
    npar = max(1, min(num_parallel, blocks_total))
    steps = -(-blocks_total // npar)

    kernel = functools.partial(
        _logistic_loss_kernel,
        n=n, inv_n=1.0 / float(n), block_rows=br, steps=steps,
    )

    def in_map(p, s):
        # Clamp so the duplicated trailing blocks of the last partition stay in
        # bounds (their contribution is masked to zero inside the kernel).
        return (jnp.minimum(p * steps + s, blocks_total - 1), 0)

    partials = pl.pallas_call(
        kernel,
        out_shape=jax.ShapeDtypeStruct((npar * 8, _LANES), jnp.float32),
        grid=(npar, steps),
        in_specs=[
            pl.BlockSpec((br, _LANES), in_map),
            pl.BlockSpec((br, _LANES), in_map),
        ],
        out_specs=pl.BlockSpec((8, _LANES), lambda p, s: (p, 0)),
        scratch_shapes=[pltpu.VMEM((br, _LANES), jnp.float32)],
        compiler_params=pltpu.CompilerParams(
            dimension_semantics=("parallel", "arbitrary"),
        ),
    )(pos2d, neg2d)

    # Each partition's (8,128) output block is filled with its (already 1/N-scaled)
    # partial sum; pick one value per partition and combine.
    per_partition = partials.reshape(npar, 8, _LANES)[:, 0, 0]
    return jnp.sum(per_partition)


if __name__ == "__main__":
    key = jax.random.PRNGKey(0)

    def ref_loss(p, q):
        return jnp.mean((1.0 - jax.nn.sigmoid(p)) + jax.nn.sigmoid(q))

    # Small shapes consistent with the module's example (1-D score vectors):
    #   (8, 1024)    tiny module-style vectors (single tile, lane-tail masking),
    #   (300, 1024)  non-multiple-of-128 size,
    #   (5000, 16)   ragged last block + duplicated clamped block + lane tail,
    #   (8192, 16)   lane-aligned (no wrapper padding), multi-step gridded reduce.
    for n_elems, brows in [(8, 1024), (300, 1024), (5000, 16), (8192, 16)]:
        kp, kn = jax.random.split(jax.random.fold_in(key, n_elems))
        positive_score = jax.random.normal(kp, (n_elems,), dtype=jnp.float32)
        negative_score = jax.random.normal(kn, (n_elems,), dtype=jnp.float32)

        loss = logistic_loss(positive_score, negative_score, block_rows=brows)
        jax.block_until_ready(loss)

        ref = ref_loss(positive_score, negative_score)
        # approx=True reciprocal has ~1e-4 relative error; loss is O(1).
        assert jnp.allclose(loss, ref, atol=2e-3, rtol=2e-3), (n_elems, loss, ref)

    print("KERNEL_OK")
</pallas_src>

<mosaic_0001>
module attributes {stable_mosaic.version = 11 : i64} {
  func.func @_logistic_loss_kernel(%arg0: i32, %arg1: i32, %arg2: memref<16x128xf32, #tpu.memory_space<vmem>>, %arg3: memref<16x128xf32, #tpu.memory_space<vmem>>, %arg4: memref<8x128xf32, #tpu.memory_space<vmem>>, %arg5: memref<16x128xf32, #tpu.memory_space<vmem>>) attributes {dimension_semantics = [#tpu.dimension_semantics<parallel>, #tpu.dimension_semantics<arbitrary>], iteration_bounds = array<i64: 1, 1>, scalar_prefetch = 0 : i64, scratch_operands = 1 : i64, tpu.core_type = #tpu.core_type<tc>, window_params = [{transform_indices = @transform_0, window_bounds = array<i64: 16, 128>}, {transform_indices = @transform_1, window_bounds = array<i64: 16, 128>}, {transform_indices = @transform_2, window_bounds = array<i64: 8, 128>}]} {
    %c0_i32 = arith.constant 0 : i32
    %0 = arith.cmpi eq, %arg1, %c0_i32 : i32
    %1 = arith.extui %0 : i1 to i32
    %c0_i32_0 = arith.constant 0 : i32
    %2 = arith.cmpi ne, %1, %c0_i32_0 : i32
    scf.if %2 {
      %cst_15 = arith.constant 0.000000e+00 : f32
      %40 = vector.broadcast %cst_15 : f32 to vector<16x128xf32>
      %c0_16 = arith.constant 0 : index
      %c0_17 = arith.constant 0 : index
      %41 = vector.load %arg5[%c0_16, %c0_17] : memref<16x128xf32, #tpu.memory_space<vmem>>, vector<16x128xf32>
      tpu.vector_store %arg5[%c0_16, %c0_17], %40 {strides = array<i32>} : memref<16x128xf32, #tpu.memory_space<vmem>>, vector<16x128xf32>,
    } else {
    }
    %c1_i32 = arith.constant 1 : i32
    %3 = arith.muli %arg0, %c1_i32 : i32
    %4 = arith.addi %3, %arg1 : i32
    %5 = tpu.iota {dimensions = array<i32: 0>} : vector<16x128xi32>
    %6 = tpu.iota {dimensions = array<i32: 1>} : vector<16x128xi32>
    %c2048_i32 = arith.constant 2048 : i32
    %7 = arith.muli %4, %c2048_i32 : i32
    %c128_i32 = arith.constant 128 : i32
    %8 = vector.broadcast %c128_i32 : i32 to vector<16x128xi32>
    %9 = arith.muli %5, %8 : vector<16x128xi32>
    %10 = vector.broadcast %7 : i32 to vector<16x128xi32>
    %11 = arith.addi %10, %9 : vector<16x128xi32>
    %12 = arith.addi %11, %6 : vector<16x128xi32>
    %c8_i32 = arith.constant 8 : i32
    %13 = vector.broadcast %c8_i32 : i32 to vector<16x128xi32>
    %14 = arith.cmpi slt, %12, %13 : vector<16x128xi32>
    %c0 = arith.constant 0 : index
    %c0_1 = arith.constant 0 : index
    %15 = vector.load %arg2[%c0, %c0_1] : memref<16x128xf32, #tpu.memory_space<vmem>>, vector<16x128xf32>
    %c0_2 = arith.constant 0 : index
    %c0_3 = arith.constant 0 : index
    %16 = vector.load %arg3[%c0_2, %c0_3] : memref<16x128xf32, #tpu.memory_space<vmem>>, vector<16x128xf32>
    %cst = arith.constant 6.000000e+01 : f32
    %17 = vector.broadcast %cst : f32 to vector<16x128xf32>
    %18 = arith.minimumf %15, %17 : vector<16x128xf32>
    %19 = math.exp %18 : vector<16x128xf32>
    %cst_4 = arith.constant 1.000000e+00 : f32
    %20 = vector.broadcast %cst_4 : f32 to vector<16x128xf32>
    %21 = arith.addf %20, %19 : vector<16x128xf32>
    %22 = tpu.reciprocal %21 {approx = true} : vector<16x128xf32> -> vector<16x128xf32>
    %cst_5 = arith.constant 0.000000e+00 : f32
    %23 = vector.broadcast %cst_5 : f32 to vector<16x128xf32>
    %24 = arith.subf %23, %16 : vector<16x128xf32>
    %cst_6 = arith.constant 6.000000e+01 : f32
    %25 = vector.broadcast %cst_6 : f32 to vector<16x128xf32>
    %26 = arith.minimumf %24, %25 : vector<16x128xf32>
    %27 = math.exp %26 : vector<16x128xf32>
    %cst_7 = arith.constant 1.000000e+00 : f32
    %28 = vector.broadcast %cst_7 : f32 to vector<16x128xf32>
    %29 = arith.addf %28, %27 : vector<16x128xf32>
    %30 = tpu.reciprocal %29 {approx = true} : vector<16x128xf32> -> vector<16x128xf32>
    %c0_8 = arith.constant 0 : index
    %c0_9 = arith.constant 0 : index
    %31 = vector.load %arg5[%c0_8, %c0_9] : memref<16x128xf32, #tpu.memory_space<vmem>>, vector<16x128xf32>
    %32 = arith.addf %22, %30 : vector<16x128xf32>
    %cst_10 = arith.constant 0.000000e+00 : f32
    %33 = vector.broadcast %cst_10 : f32 to vector<16x128xf32>
    %34 = arith.select %14, %32, %33 : vector<16x128xi1>, vector<16x128xf32>
    %35 = arith.addf %31, %34 : vector<16x128xf32>
    %c0_11 = arith.constant 0 : index
    %c0_12 = arith.constant 0 : index
    %36 = vector.load %arg5[%c0_11, %c0_12] : memref<16x128xf32, #tpu.memory_space<vmem>>, vector<16x128xf32>
    tpu.vector_store %arg5[%c0_11, %c0_12], %35 {strides = array<i32>} : memref<16x128xf32, #tpu.memory_space<vmem>>, vector<16x128xf32>,
    %c0_i32_13 = arith.constant 0 : i32
    %37 = arith.cmpi eq, %arg1, %c0_i32_13 : i32
    %38 = arith.extui %37 : i1 to i32
    %c0_i32_14 = arith.constant 0 : i32
    %39 = arith.cmpi ne, %38, %c0_i32_14 : i32
    scf.if %39 {
      %c0_15 = arith.constant 0 : index
      %c0_16 = arith.constant 0 : index
      %40 = vector.load %arg5[%c0_15, %c0_16] : memref<16x128xf32, #tpu.memory_space<vmem>>, vector<16x128xf32>
      %41 = vector.shape_cast %40 : vector<16x128xf32> to vector<1x16x128xf32>
      %cst_17 = arith.constant dense<0.000000e+00> : vector<1xf32>
      %42 = vector.multi_reduction <add>, %41, %cst_17 [1, 2] : vector<1x16x128xf32> to vector<1xf32>
      %43 = vector.shape_cast %42 : vector<1xf32> to vector<1x1x1xf32>
      %44 = vector.extract %43[0, 0, 0] : f32 from vector<1x1x1xf32>
      %cst_18 = arith.constant 1.250000e-01 : f32
      %45 = arith.mulf %44, %cst_18 : f32
      %46 = vector.broadcast %45 : f32 to vector<8x128xf32>
      %c0_19 = arith.constant 0 : index
      %c0_20 = arith.constant 0 : index
      %47 = vector.load %arg4[%c0_19, %c0_20] : memref<8x128xf32, #tpu.memory_space<vmem>>, vector<8x128xf32>
      tpu.vector_store %arg4[%c0_19, %c0_20], %46 {strides = array<i32>} : memref<8x128xf32, #tpu.memory_space<vmem>>, vector<8x128xf32>,
    } else {
    }
    return
  }
  func.func @transform_0(%arg0: i32, %arg1: i32) -> (i32, i32) {
    %c1_i32 = arith.constant 1 : i32
    %0 = arith.muli %arg0, %c1_i32 : i32
    %1 = arith.addi %0, %arg1 : i32
    %c0_i32 = arith.constant 0 : i32
    %2 = arith.minsi %1, %c0_i32 : i32
    %c0_i32_0 = arith.constant 0 : i32
    %c0_i32_1 = arith.constant 0 : i32
    return %2, %c0_i32_0 : i32, i32
  }
  func.func @transform_1(%arg0: i32, %arg1: i32) -> (i32, i32) {
    %c1_i32 = arith.constant 1 : i32
    %0 = arith.muli %arg0, %c1_i32 : i32
    %1 = arith.addi %0, %arg1 : i32
    %c0_i32 = arith.constant 0 : i32
    %2 = arith.minsi %1, %c0_i32 : i32
    %c0_i32_0 = arith.constant 0 : i32
    %c0_i32_1 = arith.constant 0 : i32
    return %2, %c0_i32_0 : i32, i32
  }
  func.func @transform_2(%arg0: i32, %arg1: i32) -> (i32, i32) {
    %c0_i32 = arith.constant 0 : i32
    %c0_i32_0 = arith.constant 0 : i32
    return %arg0, %c0_i32 : i32, i32
  }
}

</mosaic_0001>

<bundles_post_ra>
// kernel: tpu_custom_call.1
= control target key start
LH: loop header
LB: loop body
LE: loop exit
PB: predicated region body
PF: predicated region fallthrough
CT: control target
= control target key end

     0   :  { %7 = vsyncpa [#allocation4], 0  ;;  %s274_s0 = inlined_call_operand.hbm [shape: f32[16,128], index: 0, kind: input, shape index: {}]   ;;  %s275_s1 = inlined_call_operand.hbm [shape: f32[16,128], index: 1, kind: input, shape index: {}]   ;;  %s276_s2 = inlined_call_operand.hbm [shape: f32[8,128], index: 2, kind: output, shape index: {}]  }
   0x1   :  { %8 = vsyncpa [#allocation7], 0 }
   0x2   :  { %9 = vsyncpa [#allocation5], 0  ;;  %s245_s9 = smov [#allocation3]  }
   0x3   :  { %s21_s10 = sshll.u32 %s245_s9, 4  ;;  %s22_s10 = int_to_ptr.vmem [resolvable:$true] %s21_s10 }
   0x4   :  { %s187_s11 = scalar_lea.vmem %s22_s10, 256  ;;  %p192_p1 = scmp.lt.s32.totalorder %s22_s10, %s22_s10 }
   0x5   :  { %p188_p0 = scmp.ne.s32.totalorder %s22_s10, %s187_s11  ;;  %p193_p2 = scmp.lt.s32.totalorder %s187_s11, %s187_s11 }
   0x7   :  { %p194_p3 = por %p193_p2, %p192_p1 }
   0x9   :  { %p195_p4 = pnand %p194_p3, %p188_p0 }
   0xb   :  { %198 = shalt.err (!%p195_p4)
}
   0xc   :  { %s246_s12 = smov 128   ;;  %s247_s13 = smov 8  }
   0xd   :  { %27 = dma.hbm_to_vmem [thread:$0]  %s274_s0, 256, %s22_s10, [#allocation4], %s246_s12, %s246_s12, %s247_s13  }
   0xe   :  { %s248_s16 = smov [#allocation6]  }
   0xf   :  { %s39_s17 = sshll.u32 %s248_s16, 4  ;;  %s40_s17 = int_to_ptr.vmem [resolvable:$true] %s39_s17 }
  0x10   :  { %s207_s18 = scalar_lea.vmem %s40_s17, 256  ;;  %p212_p6 = scmp.lt.s32.totalorder %s40_s17, %s40_s17 }
  0x11   :  { %p208_p5 = scmp.ne.s32.totalorder %s40_s17, %s207_s18  ;;  %p213_p7 = scmp.lt.s32.totalorder %s207_s18, %s207_s18 }
  0x13   :  { %p214_p8 = por %p213_p7, %p212_p6 }
  0x15   :  { %p215_p9 = pnand %p214_p8, %p208_p5 }
  0x17   :  { %218 = shalt.err (!%p215_p9)
}
  0x18   :  { %45 = dma.hbm_to_vmem [thread:$0]  %s275_s1, 256, %s40_s17, [#allocation7], %s246_s12, %s246_s12, %s247_s13  }
  0x19   :  { %239 = dma.done.wait [#allocation4], 256  }
  0x1a   :  { %240 = vsyncadd [#allocation4], 4294967040 }
  0x1b   :  { %241 = dma.done.wait [#allocation7], 256  }
  0x1c   :  { %242 = vsyncadd [#allocation7], 4294967040  ;;  %v82_v0 = vld [vmem:[#allocation3] sm:$0xff]  ;;  %v83_v1 = vld [vmem:[#allocation3 + $0x8] sm:$0xff]  ;;  %v67_v15 = vlaneseq  ;;  %s249_s0 = smov [#allocation8]  }
  0x1d   :  { %v84_v2 = vld [vmem:[#allocation6] sm:$0xff]  ;;  %v85_v3 = vld [vmem:[#allocation6 + $0x8] sm:$0xff]  ;;  %v86_v4 = vmin.f32 %v82_v0, 60.0  ;;  %v87_v5 = vmin.f32 %v83_v1, 60.0  ;;  %s142_s1 = sshll.u32 %s249_s0, 4  ;;  %s143_s1 = int_to_ptr.vmem [resolvable:$true] %s142_s1 }
  0x1e   :  { %v96_v6 = vsub.f32 0.0, %v84_v2  ;;  %v97_v7 = vsub.f32 0.0, %v85_v3  ;;  %v68_v21 = vshrl.u32 %v67_v15, 7  ;;  %v71_v25 = vand.u32 127, %v67_v15  ;;  %s219_s23 = scalar_lea.vmem %s143_s1, 128  ;;  %p224_p11 = scmp.lt.s32.totalorder %s143_s1, %s143_s1 }
  0x1f   :  { %v88_v8 = vmul.f32 1.442695, %v86_v4  ;;  %v90_v9 = vmul.f32 1.442695, %v87_v5  ;;  %p220_p10 = scmp.ne.s32.totalorder %s143_s1, %s219_s23  ;;  %p225_p12 = scmp.lt.s32.totalorder %s219_s23, %s219_s23 }
  0x20   :  { %v98_v10 = vmin.f32 %v96_v6, 60.0  ;;  %v99_v11 = vmin.f32 %v97_v7, 60.0  ;;  %v69_v24 = vadd.s32 8, %v68_v21  ;;  %v73_v26 = vmul.u32 128, %v68_v21 }
  0x21   :  { %163 = vpow2.f32 %v88_v8  ;;  %p226_p13 = por %p225_p12, %p224_p11 }
  0x22   :  { %165 = vpow2.f32 %v90_v9  ;;  %v100_v12 = vmul.f32 1.442695, %v98_v10  ;;  %v102_v13 = vmul.f32 1.442695, %v99_v11  ;;  %v74_v27 = vmul.u32 128, %v69_v24 }
  0x23   :  { %v78_v28 = vadd.s32 %v73_v26, %v71_v25  ;;  %p227_p0 = pnand %p226_p13, %p220_p10 }
  0x24   :  { %167 = vpow2.f32 %v100_v12  ;;  %v79_v29 = vadd.s32 %v74_v27, %v71_v25 }
  0x25   :  { %169 = vpow2.f32 %v102_v13  ;;  %vm80_vm0 = vcmp.lt.s32.totalorder %v78_v28, 8 }
  0x26   :  { %vm81_vm1 = vcmp.lt.s32.totalorder %v79_v29, 8 }
  0x2e   :  { %v164_v14 = vpop.eup %163 }
  0x2f   :  { %v166_v16 = vpop.eup %165  ;;  %v92_v17 = vadd.f32 1.0, %v164_v14 }
  0x30   :  { %v93_v18 = vadd.f32 1.0, %v166_v16 }
  0x31   :  { %v168_v19 = vpop.eup %167  ;;  %171 = vrcp.f32 %v92_v17 }
  0x32   :  { %v170_v20 = vpop.eup %169  ;;  %v104_v22 = vadd.f32 1.0, %v168_v19  ;;  %173 = vrcp.f32 %v93_v18 }
  0x33   :  { %v105_v23 = vadd.f32 1.0, %v170_v20 }
  0x34   :  { %175 = vrcp.f32 %v104_v22 }
  0x35   :  { %177 = vrcp.f32 %v105_v23 }
  0x3e   :  { %v172_v30 = vpop.eup %171 }
  0x3f   :  { %v174_v31 = vpop.eup %173 }
  0x41   :  { %v176_v32 = vpop.eup %175 }
  0x42   :  { %v178_v33 = vpop.eup %177  ;;  %v110_v34 = vadd.f32 %v176_v32, %v172_v30 }
  0x43   :  { %v111_v35 = vadd.f32 %v178_v33, %v174_v31 }
  0x44   :  { %v112_v36 = vsel %vm80_vm0, %v110_v34, 0.0 }
  0x45   :  { %v113_v37 = vsel %vm81_vm1, %v111_v35, 0.0 }
  0x46   :  { %v123_v38 = vadd.f32 %v113_v37, %v112_v36 }
  0x48   :  { %124 = vadd.xlane.f32.xlu0 %v123_v38 }
  0xd1   :  { %v125_v39 = vpop.xlane.xlu0 %124 }
  0xd2   :  { %v126_v40 = vrot.slane %v125_v39, 4 }
  0xd4   :  { %v127_v41 = vadd.f32 %v126_v40, %v125_v39 }
  0xd6   :  { %v128_v42 = vrot.slane %v127_v41, 2 }
  0xd8   :  { %v129_v43 = vadd.f32 %v128_v42, %v127_v41 }
  0xda   :  { %v130_v44 = vrot.slane %v129_v43, 1 }
  0xdc   :  { %v131_v45 = vadd.f32 %v130_v44, %v129_v43 }
  0xde   :  { %156 = vpush %v131_v45 }
 0x10f   :  { %s157_s21 = spop %156 }
 0x110   :  { %s133_s22 = smul.f32 0.125, %s157_s21 }
 0x112   :  { %v134_v46 = vstv %s133_s22 }
 0x113   :  { %135 = vst [vmem:[#allocation8] sm:$0xff] %v134_v46 }
 0x114   :  { %230 = shalt.err (!%p227_p0)
}
 0x115   :  { %145 = dma.vmem_to_hbm [thread:$0]  %s143_s1, 128, %s276_s2, [#allocation5]  }
 0x116   :  { %243 = dma.done.wait [#allocation5], 128  }
 0x117   :  { %244 = vsyncadd [#allocation5], 4294967168 }
 0x118   :  { %149 = vsyncpa [#allocation4], 1 }
 0x119   :  { %150 = vsyncpa [#allocation7], 1 }
 0x11a   :  { %151 = vsyncpa [#allocation5], 1 }

</bundles_post_ra>
